<compile_context>
chip_gen: v6e
topology: v6e:2x2x1
jax: 0.10.0
libtpu: 0.0.40
codegen_flags: <defaults>
</compile_context>

<pallas_src>
import functools

import jax
import jax.numpy as jnp
from jax import lax
from jax.experimental import pallas as pl
from jax.experimental.pallas import tpu as pltpu

LANE = 128        # lane width (last dim)
TM_MAX = 8192     # sublane-rows per grid step (4 MiB per f32 input block)
CHUNK_MAX = 64    # rows per inner fori_loop chunk (stays in vregs)


def _round_up(a, b):
    return ((a + b - 1) // b) * b


def _pick_chunk(tm):
    for c in (64, 32, 16, 8):
        if tm % c == 0:
            return c
    return 8


def _omni_partials_kernel(x_ref, t_ref, o_ref, *, rows_valid, tail, chunk, unroll):
    """Reduce one (tm, 128) block of x and t to six (8, 128) partial sums.

    o_ref (squeezed block) shape: (6, 8, 128) float32:
      [0]=sum(x) [1]=sum(t) [2]=sum(x*t) [3]=sum(x*x) [4]=sum(t*t) [5]=sum(bce)
    """
    i = pl.program_id(0)
    tm, lane = x_ref.shape
    n_chunks = tm // chunk

    def emit(mask_rows):
        def body(k, carry):
            sx, st, sxt, sxx, stt, sbce = carry
            off = pl.multiple_of(k * chunk, chunk)
            x = x_ref[pl.ds(off, chunk), :].astype(jnp.float32)
            t = t_ref[pl.ds(off, chunk), :].astype(jnp.float32)
            if mask_rows:
                # Last grid block may extend past the real array; zero the
                # invalid rows BEFORE the logs (zeroed (x,t) pairs contribute
                # exactly 0 to every sum under the -100 clamp).
                row = (jax.lax.broadcasted_iota(jnp.int32, (chunk, lane), 0)
                       + i * tm + off)
                valid = row < rows_valid
                x = jnp.where(valid, x, 0.0)
                t = jnp.where(valid, t, 0.0)

            # Per-element BCE with PyTorch's log clamp at -100, refactored to
            # -(log1mx + t*(logx - log1mx)) to save one temp and one multiply.
            log_x = jnp.maximum(jnp.log(x), -100.0)
            log_1mx = jnp.maximum(jnp.log(1.0 - x), -100.0)
            bce = -(log_1mx + t * (log_x - log_1mx))

            def red(v):  # (chunk, lane) -> (8, lane): pure vreg (VALU) adds
                return jnp.sum(v.reshape(chunk // 8, 8, lane), axis=0)

            return (sx + red(x), st + red(t), sxt + red(x * t),
                    sxx + red(x * x), stt + red(t * t), sbce + red(bce))

        zeros = jnp.zeros((8, lane), jnp.float32)
        acc = lax.fori_loop(0, n_chunks, body, (zeros,) * 6, unroll=unroll)
        for k in range(6):
            o_ref[k] = acc[k]

    if not tail:
        emit(False)
    else:
        last = pl.num_programs(0) - 1

        @pl.when(i < last)
        def _():
            emit(False)

        @pl.when(i == last)
        def _():
            emit(True)


def _tail_sums(x, t):
    """Six sums for the <128-element unaligned remainder (plain JAX)."""
    x = x.astype(jnp.float32)
    t = t.astype(jnp.float32)
    log_x = jnp.maximum(jnp.log(x), -100.0)
    log_1mx = jnp.maximum(jnp.log(1.0 - x), -100.0)
    bce = -(log_1mx + t * (log_x - log_1mx))
    return jnp.stack([x.sum(), t.sum(), (x * t).sum(),
                      (x * x).sum(), (t * t).sum(), bce.sum()])


@jax.jit
def omni_comprehensive_loss(inputs, targets):
    """Pallas-backed equivalent of PyTorch omni_comprehensive_loss.forward."""
    alpha = 0.5
    beta = 0.1
    adding_term = 1.0

    x = jnp.ravel(inputs)        # keep native dtype in HBM; cast inside kernel
    t = jnp.ravel(targets)
    n = x.shape[0]
    rows = n // LANE
    rem = n - rows * LANE

    s = jnp.zeros((6,), jnp.float32)

    if rows > 0:
        n_main = rows * LANE
        if rem == 0:
            x2 = x.reshape(rows, LANE)        # free bitcast, no HBM copy
            t2 = t.reshape(rows, LANE)
        else:
            x2 = x[:n_main].reshape(rows, LANE)
            t2 = t[:n_main].reshape(rows, LANE)

        tm = min(TM_MAX, _round_up(rows, 8))  # multiple of 8, capped at TM_MAX
        chunk = _pick_chunk(tm)
        n_chunks = tm // chunk
        unroll = max(1, min(8, n_chunks))
        nb = pl.cdiv(rows, tm)
        tail = (rows % tm) != 0               # only the last block can be partial

        kernel = functools.partial(_omni_partials_kernel, rows_valid=rows,
                                   tail=tail, chunk=chunk, unroll=unroll)

        # Double-buffered input working set plus slack; > v5e's 16 MiB default,
        # < v7x's 64 MiB physical.
        block_bytes = tm * LANE * (x2.dtype.itemsize + t2.dtype.itemsize)
        vmem_limit = min(64 << 20, max(32 << 20, 2 * block_bytes + (8 << 20)))

        out_bytes = nb * 6 * 8 * LANE * 4
        cost = pl.CostEstimate(
            flops=16 * n_main,
            transcendentals=2 * n_main,
            bytes_accessed=x2.size * x2.dtype.itemsize
            + t2.size * t2.dtype.itemsize
            + out_bytes,
        )

        partials = pl.pallas_call(
            kernel,
            out_shape=jax.ShapeDtypeStruct((nb, 6, 8, LANE), jnp.float32),
            grid_spec=pltpu.PrefetchScalarGridSpec(
                num_scalar_prefetch=0,
                grid=(nb,),
                in_specs=[
                    pl.BlockSpec((tm, LANE), lambda i: (i, 0)),
                    pl.BlockSpec((tm, LANE), lambda i: (i, 0)),
                ],
                out_specs=pl.BlockSpec((None, 6, 8, LANE), lambda i: (i, 0, 0, 0)),
            ),
            compiler_params=pltpu.CompilerParams(
                # TODO(synk): on v7x use pltpu.CORE_PARALLEL here to explicitly
                # shard the block loop across both TensorCores.
                dimension_semantics=("parallel",),
                vmem_limit_bytes=int(vmem_limit),
            ),
            cost_estimate=cost,
        )(x2, t2)

        s = s + jnp.sum(partials, axis=(0, 2, 3))   # (6,) global sums, f32

    if rem > 0:
        # Unaligned remainder (<128 elements) handled in plain JAX — avoids a
        # full-array jnp.pad (a whole extra HBM read+write of both operands).
        s = s + _tail_sums(x[rows * LANE:], t[rows * LANE:])

    s_x, s_t, s_xt, s_xx, s_tt, s_bce = (s[k] for k in range(6))

    n_f = jnp.float32(n)
    mean_x = s_x / n_f
    mean_t = s_t / n_f
    # torch .std() default is unbiased (correction = 1)
    var_x = (s_xx - n_f * mean_x * mean_x) / (n_f - 1.0)
    var_t = (s_tt - n_f * mean_t * mean_t) / (n_f - 1.0)
    std_x = jnp.sqrt(jnp.maximum(var_x, 0.0))
    std_t = jnp.sqrt(jnp.maximum(var_t, 0.0))
    cov_sum = s_xt - n_f * mean_x * mean_t          # sum((x-mx)*(t-mt))
    # np.correlate(c, d, 'valid') on equal-length vectors -> single dot product
    ncc = cov_sum / (std_x * std_t * n_f)

    tp = s_xt
    fp = s_x - s_xt
    fn = s_t - s_xt
    tversky = (tp + adding_term) / (tp + beta * fp + (1.0 - beta) * fn + adding_term)

    bce = s_bce / n_f
    return (1.0 - (alpha * ncc + (1.0 - alpha) * tversky)) * bce


if __name__ == "__main__":
    key = jax.random.PRNGKey(0)
    k1, k2 = jax.random.split(key)

    # NCHW shapes consistent with a segmentation loss.
    B, C, H, W = 2, 4, 16, 16
    inp = jax.nn.sigmoid(jax.random.normal(k1, (B, C, H, W), dtype=jnp.float32))
    tgt = (jax.random.uniform(k2, (B, C, H, W)) > 0.5).astype(jnp.float32)

    loss = omni_comprehensive_loss(inp, tgt)
    loss = jax.block_until_ready(loss)

    # Pure-JAX reference (same math as the PyTorch module).
    xf = inp.reshape(-1).astype(jnp.float32)
    tf = tgt.reshape(-1).astype(jnp.float32)
    n = xf.shape[0]
    log_x = jnp.maximum(jnp.log(xf), -100.0)
    log_1mx = jnp.maximum(jnp.log(1.0 - xf), -100.0)
    bce = jnp.mean(-(tf * log_x + (1.0 - tf) * log_1mx))
    mx, mt = jnp.mean(xf), jnp.mean(tf)
    sdx = jnp.sqrt(jnp.sum((xf - mx) ** 2) / (n - 1))
    sdt = jnp.sqrt(jnp.sum((tf - mt) ** 2) / (n - 1))
    ncc = jnp.sum((xf - mx) * (tf - mt)) / (sdx * sdt * n)
    tp = jnp.sum(xf * tf)
    fp = jnp.sum((1.0 - tf) * xf)
    fn = jnp.sum(tf * (1.0 - xf))
    tversky = (tp + 1.0) / (tp + 0.1 * fp + 0.9 * fn + 1.0)
    ref = (1.0 - (0.5 * ncc + 0.5 * tversky)) * bce

    assert jnp.allclose(loss, ref, atol=1e-4, rtol=1e-3), (loss, ref)
    print("KERNEL_OK")
</pallas_src>

<mosaic_0001>
module attributes {stable_mosaic.version = 11 : i64} {
  func.func @_omni_partials_kernel(%arg0: i32, %arg1: memref<16x128xf32, #tpu.memory_space<vmem>>, %arg2: memref<16x128xf32, #tpu.memory_space<vmem>>, %arg3: memref<1x6x8x128xf32, #tpu.memory_space<vmem>>) attributes {dimension_semantics = [#tpu.dimension_semantics<parallel>], iteration_bounds = array<i64: 1>, scalar_prefetch = 0 : i64, scratch_operands = 0 : i64, tpu.core_type = #tpu.core_type<tc>, window_params = [{transform_indices = @transform_0, window_bounds = array<i64: 16, 128>}, {transform_indices = @transform_1, window_bounds = array<i64: 16, 128>}, {transform_indices = @transform_2, window_bounds = array<i64: 1, 6, 8, 128>}]} {
    %cst = arith.constant 0.000000e+00 : f32
    %0 = vector.broadcast %cst : f32 to vector<8x128xf32>
    %c0_i32 = arith.constant 0 : i32
    %c16_i32 = arith.constant 16 : i32
    %1 = arith.muli %c0_i32, %c16_i32 : i32
    %2 = tpu.assume_multiple %1, 16 : i32
    %3 = arith.index_cast %2 : i32 to index
    %c0 = arith.constant 0 : index
    %4 = vector.load %arg1[%3, %c0] : memref<16x128xf32, #tpu.memory_space<vmem>>, vector<16x128xf32>
    %5 = arith.index_cast %2 : i32 to index
    %c0_0 = arith.constant 0 : index
    %6 = vector.load %arg2[%5, %c0_0] : memref<16x128xf32, #tpu.memory_space<vmem>>, vector<16x128xf32>
    %7 = math.log %4 : vector<16x128xf32>
    %cst_1 = arith.constant -1.000000e+02 : f32
    %8 = vector.broadcast %cst_1 : f32 to vector<16x128xf32>
    %9 = arith.maximumf %7, %8 : vector<16x128xf32>
    %cst_2 = arith.constant 1.000000e+00 : f32
    %10 = vector.broadcast %cst_2 : f32 to vector<16x128xf32>
    %11 = arith.subf %10, %4 : vector<16x128xf32>
    %12 = math.log %11 : vector<16x128xf32>
    %cst_3 = arith.constant -1.000000e+02 : f32
    %13 = vector.broadcast %cst_3 : f32 to vector<16x128xf32>
    %14 = arith.maximumf %12, %13 : vector<16x128xf32>
    %15 = arith.subf %9, %14 : vector<16x128xf32>
    %16 = arith.mulf %6, %15 : vector<16x128xf32>
    %17 = arith.addf %14, %16 : vector<16x128xf32>
    %cst_4 = arith.constant 0.000000e+00 : f32
    %18 = vector.broadcast %cst_4 : f32 to vector<16x128xf32>
    %19 = arith.subf %18, %17 : vector<16x128xf32>
    %20 = vector.shape_cast %4 : vector<16x128xf32> to vector<2x8x128xf32>
    %cst_5 = arith.constant dense<0.000000e+00> : vector<8x128xf32>
    %21 = vector.multi_reduction <add>, %20, %cst_5 [0] : vector<2x8x128xf32> to vector<8x128xf32>
    %22 = arith.addf %0, %21 : vector<8x128xf32>
    %23 = vector.shape_cast %6 : vector<16x128xf32> to vector<2x8x128xf32>
    %cst_6 = arith.constant dense<0.000000e+00> : vector<8x128xf32>
    %24 = vector.multi_reduction <add>, %23, %cst_6 [0] : vector<2x8x128xf32> to vector<8x128xf32>
    %25 = arith.addf %0, %24 : vector<8x128xf32>
    %26 = arith.mulf %4, %6 : vector<16x128xf32>
    %27 = vector.shape_cast %26 : vector<16x128xf32> to vector<2x8x128xf32>
    %cst_7 = arith.constant dense<0.000000e+00> : vector<8x128xf32>
    %28 = vector.multi_reduction <add>, %27, %cst_7 [0] : vector<2x8x128xf32> to vector<8x128xf32>
    %29 = arith.addf %0, %28 : vector<8x128xf32>
    %30 = arith.mulf %4, %4 : vector<16x128xf32>
    %31 = vector.shape_cast %30 : vector<16x128xf32> to vector<2x8x128xf32>
    %cst_8 = arith.constant dense<0.000000e+00> : vector<8x128xf32>
    %32 = vector.multi_reduction <add>, %31, %cst_8 [0] : vector<2x8x128xf32> to vector<8x128xf32>
    %33 = arith.addf %0, %32 : vector<8x128xf32>
    %34 = arith.mulf %6, %6 : vector<16x128xf32>
    %35 = vector.shape_cast %34 : vector<16x128xf32> to vector<2x8x128xf32>
    %cst_9 = arith.constant dense<0.000000e+00> : vector<8x128xf32>
    %36 = vector.multi_reduction <add>, %35, %cst_9 [0] : vector<2x8x128xf32> to vector<8x128xf32>
    %37 = arith.addf %0, %36 : vector<8x128xf32>
    %38 = vector.shape_cast %19 : vector<16x128xf32> to vector<2x8x128xf32>
    %cst_10 = arith.constant dense<0.000000e+00> : vector<8x128xf32>
    %39 = vector.multi_reduction <add>, %38, %cst_10 [0] : vector<2x8x128xf32> to vector<8x128xf32>
    %40 = arith.addf %0, %39 : vector<8x128xf32>
    %c1_i32 = arith.constant 1 : i32
    %c0_11 = arith.constant 0 : index
    %c0_12 = arith.constant 0 : index
    %c0_13 = arith.constant 0 : index
    %c0_14 = arith.constant 0 : index
    %41 = vector.load %arg3[%c0_11, %c0_12, %c0_13, %c0_14] : memref<1x6x8x128xf32, #tpu.memory_space<vmem>>, vector<1x1x8x128xf32>
    %42 = vector.shape_cast %41 : vector<1x1x8x128xf32> to vector<8x128xf32>
    %43 = vector.shape_cast %22 : vector<8x128xf32> to vector<1x1x8x128xf32>
    tpu.vector_store %arg3[%c0_11, %c0_12, %c0_13, %c0_14], %43 {strides = array<i32>} : memref<1x6x8x128xf32, #tpu.memory_space<vmem>>, vector<1x1x8x128xf32>,
    %c0_15 = arith.constant 0 : index
    %c1 = arith.constant 1 : index
    %c0_16 = arith.constant 0 : index
    %c0_17 = arith.constant 0 : index
    %44 = vector.load %arg3[%c0_15, %c1, %c0_16, %c0_17] : memref<1x6x8x128xf32, #tpu.memory_space<vmem>>, vector<1x1x8x128xf32>
    %45 = vector.shape_cast %44 : vector<1x1x8x128xf32> to vector<8x128xf32>
    %46 = vector.shape_cast %25 : vector<8x128xf32> to vector<1x1x8x128xf32>
    tpu.vector_store %arg3[%c0_15, %c1, %c0_16, %c0_17], %46 {strides = array<i32>} : memref<1x6x8x128xf32, #tpu.memory_space<vmem>>, vector<1x1x8x128xf32>,
    %c0_18 = arith.constant 0 : index
    %c2 = arith.constant 2 : index
    %c0_19 = arith.constant 0 : index
    %c0_20 = arith.constant 0 : index
    %47 = vector.load %arg3[%c0_18, %c2, %c0_19, %c0_20] : memref<1x6x8x128xf32, #tpu.memory_space<vmem>>, vector<1x1x8x128xf32>
    %48 = vector.shape_cast %47 : vector<1x1x8x128xf32> to vector<8x128xf32>
    %49 = vector.shape_cast %29 : vector<8x128xf32> to vector<1x1x8x128xf32>
    tpu.vector_store %arg3[%c0_18, %c2, %c0_19, %c0_20], %49 {strides = array<i32>} : memref<1x6x8x128xf32, #tpu.memory_space<vmem>>, vector<1x1x8x128xf32>,
    %c0_21 = arith.constant 0 : index
    %c3 = arith.constant 3 : index
    %c0_22 = arith.constant 0 : index
    %c0_23 = arith.constant 0 : index
    %50 = vector.load %arg3[%c0_21, %c3, %c0_22, %c0_23] : memref<1x6x8x128xf32, #tpu.memory_space<vmem>>, vector<1x1x8x128xf32>
    %51 = vector.shape_cast %50 : vector<1x1x8x128xf32> to vector<8x128xf32>
    %52 = vector.shape_cast %33 : vector<8x128xf32> to vector<1x1x8x128xf32>
    tpu.vector_store %arg3[%c0_21, %c3, %c0_22, %c0_23], %52 {strides = array<i32>} : memref<1x6x8x128xf32, #tpu.memory_space<vmem>>, vector<1x1x8x128xf32>,
    %c0_24 = arith.constant 0 : index
    %c4 = arith.constant 4 : index
    %c0_25 = arith.constant 0 : index
    %c0_26 = arith.constant 0 : index
    %53 = vector.load %arg3[%c0_24, %c4, %c0_25, %c0_26] : memref<1x6x8x128xf32, #tpu.memory_space<vmem>>, vector<1x1x8x128xf32>
    %54 = vector.shape_cast %53 : vector<1x1x8x128xf32> to vector<8x128xf32>
    %55 = vector.shape_cast %37 : vector<8x128xf32> to vector<1x1x8x128xf32>
    tpu.vector_store %arg3[%c0_24, %c4, %c0_25, %c0_26], %55 {strides = array<i32>} : memref<1x6x8x128xf32, #tpu.memory_space<vmem>>, vector<1x1x8x128xf32>,
    %c0_27 = arith.constant 0 : index
    %c5 = arith.constant 5 : index
    %c0_28 = arith.constant 0 : index
    %c0_29 = arith.constant 0 : index
    %56 = vector.load %arg3[%c0_27, %c5, %c0_28, %c0_29] : memref<1x6x8x128xf32, #tpu.memory_space<vmem>>, vector<1x1x8x128xf32>
    %57 = vector.shape_cast %56 : vector<1x1x8x128xf32> to vector<8x128xf32>
    %58 = vector.shape_cast %40 : vector<8x128xf32> to vector<1x1x8x128xf32>
    tpu.vector_store %arg3[%c0_27, %c5, %c0_28, %c0_29], %58 {strides = array<i32>} : memref<1x6x8x128xf32, #tpu.memory_space<vmem>>, vector<1x1x8x128xf32>,
    return
  }
  func.func @transform_0(%arg0: i32) -> (i32, i32) {
    %c0_i32 = arith.constant 0 : i32
    %c0_i32_0 = arith.constant 0 : i32
    return %arg0, %c0_i32 : i32, i32
  }
  func.func @transform_1(%arg0: i32) -> (i32, i32) {
    %c0_i32 = arith.constant 0 : i32
    %c0_i32_0 = arith.constant 0 : i32
    return %arg0, %c0_i32 : i32, i32
  }
  func.func @transform_2(%arg0: i32) -> (i32, i32, i32, i32) {
    %c0_i32 = arith.constant 0 : i32
    %c0_i32_0 = arith.constant 0 : i32
    %c0_i32_1 = arith.constant 0 : i32
    %c0_i32_2 = arith.constant 0 : i32
    return %arg0, %c0_i32, %c0_i32_0, %c0_i32_1 : i32, i32, i32, i32
  }
}

</mosaic_0001>

<bundles_post_ra>
// kernel: omni_comprehensive_loss.1
= control target key start
LH: loop header
LB: loop body
LE: loop exit
PB: predicated region body
PF: predicated region fallthrough
CT: control target
= control target key end

     0   :  { %s128_s0 = inlined_call_operand.vmem [shape: f32[16,128], index: 0, kind: input, shape index: {}]   ;;  %s129_s1 = inlined_call_operand.vmem [shape: f32[16,128], index: 1, kind: input, shape index: {}]   ;;  %s130_s2 = inlined_call_operand.vmem [shape: f32[1,6,8,128], index: 2, kind: output, shape index: {}]  }
   0x1   :  { %v11_v0 = vld [vmem:[%s128_s0] sm:$0xff]  ;;  %v12_v1 = vld [vmem:[%s128_s0 + $0x8] sm:$0xff] }
   0x2   :  { %v13_v2 = vld [vmem:[%s129_s1] sm:$0xff]  ;;  %v37_v3 = vadd.f32 %v12_v1, %v11_v0  ;;  %v14_v4 = vld [vmem:[%s129_s1 + $0x8] sm:$0xff]  ;;  %v45_v6 = vmul.f32 %v11_v0, %v11_v0  ;;  %v46_v7 = vmul.f32 %v12_v1, %v12_v1  ;;  %75 = vlog2.f32 %v11_v0 }
   0x3   :  { %v41_v5 = vmul.f32 %v13_v2, %v11_v0  ;;  %v39_v8 = vadd.f32 %v14_v4, %v13_v2  ;;  %v42_v9 = vmul.f32 %v14_v4, %v12_v1  ;;  %v49_v10 = vmul.f32 %v13_v2, %v13_v2 }
   0x4   :  { %v50_v11 = vmul.f32 %v14_v4, %v14_v4  ;;  %55 = vst [vmem:[%s130_s2] sm:$0xff] %v37_v3  ;;  %v47_v12 = vadd.f32 %v46_v7, %v45_v6  ;;  %v21_v13 = vsub.f32 1.0, %v11_v0  ;;  %v22_v14 = vsub.f32 1.0, %v12_v1 }
   0x5   :  { %70 = vst [vmem:[%s130_s2 + $0x8] sm:$0xff] %v39_v8  ;;  %v43_v15 = vadd.f32 %v42_v9, %v41_v5  ;;  %77 = vlog2.f32 %v12_v1 }
   0x6   :  { %v51_v16 = vadd.f32 %v50_v11, %v49_v10  ;;  %72 = vst [vmem:[%s130_s2 + $0x18] sm:$0xff] %v47_v12  ;;  %79 = vlog2.f32 %v21_v13 }
   0x7   :  { %71 = vst [vmem:[%s130_s2 + $0x10] sm:$0xff] %v43_v15  ;;  %81 = vlog2.f32 %v22_v14 }
   0x8   :  { %73 = vst [vmem:[%s130_s2 + $0x20] sm:$0xff] %v51_v16 }
   0xf   :  { %v76_v17 = vpop.eup %75 }
  0x10   :  { %v16_v19 = vmul.f32 0.6931472, %v76_v17 }
  0x12   :  { %v78_v18 = vpop.eup %77  ;;  %v19_v23 = vmax.f32 %v16_v19, -100.0 }
  0x13   :  { %v80_v20 = vpop.eup %79  ;;  %v18_v21 = vmul.f32 0.6931472, %v78_v18 }
  0x14   :  { %v82_v22 = vpop.eup %81  ;;  %v24_v24 = vmul.f32 0.6931472, %v80_v20 }
  0x15   :  { %v20_v25 = vmax.f32 %v18_v21, -100.0  ;;  %v26_v26 = vmul.f32 0.6931472, %v82_v22 }
  0x16   :  { %v27_v27 = vmax.f32 %v24_v24, -100.0 }
  0x17   :  { %v28_v28 = vmax.f32 %v26_v26, -100.0 }
  0x18   :  { %v29_v29 = vsub.f32 %v19_v23, %v27_v27 }
  0x19   :  { %v30_v30 = vsub.f32 %v20_v25, %v28_v28 }
  0x1a   :  { %v31_v31 = vmul.f32 %v29_v29, %v13_v2 }
  0x1b   :  { %v32_v32 = vmul.f32 %v30_v30, %v14_v4 }
  0x1c   :  { %v33_v33 = vadd.f32 %v31_v31, %v27_v27 }
  0x1d   :  { %v34_v34 = vadd.f32 %v32_v32, %v28_v28 }
  0x1e   :  { %v35_v35 = vsub.f32 0.0, %v33_v33 }
  0x1f   :  { %v36_v36 = vsub.f32 0.0, %v34_v34 }
  0x21   :  { %v53_v37 = vadd.f32 %v36_v36, %v35_v35 }
  0x23   :  { %74 = vst [vmem:[%s130_s2 + $0x28] sm:$0xff] %v53_v37 }

</bundles_post_ra>
